<compile_context>
chip_gen: v5e
topology: v5e:2x2
jax: 0.10.0
libtpu: 0.0.40
codegen_flags: <defaults>
</compile_context>

<pallas_src>
import functools

import numpy as np
import jax
import jax.numpy as jnp
from jax import lax
from jax.experimental import pallas as pl
from jax.experimental.pallas import tpu as pltpu


# ---------------------------------------------------------------------------
# small helpers
# ---------------------------------------------------------------------------
def _round_up(x, m):
    return ((x + m - 1) // m) * m


def _vmem_budget():
    """Generation-aware (tiling working-set budget, scoped vmem_limit_bytes).

    v5e/v6e have 128 MiB physical VMEM, v7x only 64 MiB; request a scoped
    limit well under physical and size tiles to ~80% of it (double buffering
    is already accounted for in the per-lane byte estimates).
    """
    try:
        phys = int(pltpu.get_tpu_info().vmem_capacity_bytes)
    except Exception:
        phys = 64 * 1024 * 1024          # conservative fallback (v7x-sized)
    limit = min(phys // 2, 40 * 1024 * 1024)
    return int(limit * 0.8), limit


def _pick_lane_tile(n, cap, per_lane_bytes, budget):
    """Pad `n` only to the next multiple of 128 and pick the largest
    128-multiple tile that (a) divides the padded extent (no masked tail),
    (b) is <= cap, and (c) keeps the pipelined working set under `budget`."""
    n_pad = max(128, _round_up(n, 128))
    cap = max(128, min(cap, (budget // max(per_lane_bytes, 1)) // 128 * 128))
    tile = 128
    t = 128
    while t <= min(cap, n_pad):
        if n_pad % t == 0:
            tile = t
        t += 128
    return tile, n_pad


# ---------------------------------------------------------------------------
# Kernel 1: spectral weight multiply (complex einsum 'bim,iom->bom')
#   x planes : (B, in_c, M_pad)    real/imag float32
#   w planes : (in_c, out_c, M_pad)
#   out      : (B, out_c, M_pad)   real/imag float32
# Grid: (M_pad // TM, B)  -- mode tile outer ("parallel"), batch inner, so the
# weight block index is constant across consecutive steps and Pallas skips the
# re-DMA (weights fetched once per mode tile, not once per batch element).
# ---------------------------------------------------------------------------
def spectral_mul_kernel(xr_ref, xi_ref, wr_ref, wi_ref, or_ref, oi_ref, *,
                        oc_chunk, unroll_in_c):
    in_c, out_c, tm = wr_ref.shape

    # Chunk out_c so the complex accumulators stay register-resident
    # (oc_chunk x tm f32 = a few vregs) instead of two full (out_c, tm) live
    # arrays that would spill to VMEM every in_c iteration.
    for oc0 in range(0, out_c, oc_chunk):
        csz = min(oc_chunk, out_c - oc0)

        def step_static(i, acc_r, acc_i):
            xr_i = xr_ref[0, i:i + 1, :]                 # (1, tm)
            xi_i = xi_ref[0, i:i + 1, :]
            wr_i = wr_ref[i, oc0:oc0 + csz, :]           # (csz, tm)
            wi_i = wi_ref[i, oc0:oc0 + csz, :]
            # (a+ib)(c+id) = (ac - bd) + i(ad + bc)
            acc_r = acc_r + xr_i * wr_i - xi_i * wi_i
            acc_i = acc_i + xr_i * wi_i + xi_i * wr_i
            return acc_r, acc_i

        acc_r = jnp.zeros((csz, tm), jnp.float32)
        acc_i = jnp.zeros((csz, tm), jnp.float32)

        if unroll_in_c:
            # small channel counts: full static unroll
            for i in range(in_c):
                acc_r, acc_i = step_static(i, acc_r, acc_i)
        else:
            # wide channel counts: bounded live ranges + sane compile time
            def body(i, carry):
                acc_r, acc_i = carry
                xr_i = xr_ref[0, pl.ds(i, 1), :]
                xi_i = xi_ref[0, pl.ds(i, 1), :]
                wr_i = wr_ref[i, oc0:oc0 + csz, :]
                wi_i = wi_ref[i, oc0:oc0 + csz, :]
                acc_r = acc_r + xr_i * wr_i - xi_i * wi_i
                acc_i = acc_i + xr_i * wi_i + xi_i * wr_i
                return acc_r, acc_i
            acc_r, acc_i = lax.fori_loop(0, in_c, body, (acc_r, acc_i),
                                         unroll=2)

        or_ref[0, oc0:oc0 + csz, :] = acc_r
        oi_ref[0, oc0:oc0 + csz, :] = acc_i


def spectral_mul(xr, xi, wr_pad, wi_pad, *, max_mode_tile=512):
    B, in_c, M = xr.shape
    _, out_c, M_pad = wr_pad.shape          # weights pre-padded to mult of 128

    budget, vmem_limit = _vmem_budget()
    # per-lane VMEM of one grid step: x (2 planes), w (2 planes), out
    # (2 planes), x2 for double buffering
    per_lane_bytes = 4 * 2 * (2 * in_c + 2 * in_c * out_c + 2 * out_c)
    tm, M_pad_x = _pick_lane_tile(M, max_mode_tile, per_lane_bytes, budget)
    assert M_pad_x == M_pad, "weights must be padded to round_up(M, 128)"

    if M_pad != M:
        pad = ((0, 0), (0, 0), (0, M_pad - M))
        xr = jnp.pad(xr, pad)
        xi = jnp.pad(xi, pad)

    n_m = M_pad // tm
    oc_chunk = 8
    unroll_in_c = in_c <= 16

    flops = 8 * B * in_c * out_c * M_pad
    # weights are fetched once per mode tile (batch reuse), not once per batch
    bytes_accessed = 4 * (2 * B * in_c * M_pad
                          + 2 * in_c * out_c * M_pad
                          + 2 * B * out_c * M_pad)

    x_blk = pl.BlockSpec((1, in_c, tm), lambda m, b: (b, 0, m))
    w_blk = pl.BlockSpec((in_c, out_c, tm), lambda m, b: (0, 0, m))
    o_blk = pl.BlockSpec((1, out_c, tm), lambda m, b: (b, 0, m))

    # Mode tiles lead and are "parallel" (megacore splits disjoint weight
    # streams across TCs); batch is inner/serial so weights stay resident.
    batch_sem = "parallel" if n_m == 1 else "arbitrary"

    or_, oi_ = pl.pallas_call(
        functools.partial(spectral_mul_kernel, oc_chunk=oc_chunk,
                          unroll_in_c=unroll_in_c),
        out_shape=(jax.ShapeDtypeStruct((B, out_c, M_pad), jnp.float32),
                   jax.ShapeDtypeStruct((B, out_c, M_pad), jnp.float32)),
        grid=(n_m, B),
        in_specs=[x_blk, x_blk, w_blk, w_blk],
        out_specs=[o_blk, o_blk],
        compiler_params=pltpu.CompilerParams(
            dimension_semantics=("parallel", batch_sem),
            vmem_limit_bytes=vmem_limit),
        cost_estimate=pl.CostEstimate(flops=flops, transcendentals=0,
                                      bytes_accessed=bytes_accessed),
    )(xr, xi, wr_pad, wi_pad)

    if M_pad != M:
        or_ = or_[:, :, :M]
        oi_ = oi_[:, :, :M]
    return or_, oi_


# ---------------------------------------------------------------------------
# Kernel 2: 1x1-conv bypass + bias + residual add + ReLU
#   x      : (B, in_c,  S_pad)
#   x_spec : (B, out_c, S_pad)   (spectral branch, flattened)
#   w      : (out_c, in_c)
#   b_tile : (out_c, TS)         bias pre-broadcast (lane dense)
#   out    : (B, out_c, S_pad)
# Grid: (B, S_pad // TS), both axes parallel.  Weight/bias have constant index
# maps so they are fetched once and stay VMEM-resident.
# ---------------------------------------------------------------------------
def bypass_act_kernel(x_ref, xs_ref, w_ref, b_ref, o_ref, *, use_mxu):
    x = x_ref[0]                        # (in_c, TS)
    y = xs_ref[0] + b_ref[...]          # residual + bias, lane-dense tile

    if use_mxu:
        # large channel counts: bf16 MXU matmul, f32 accumulate (deliberate:
        # native bf16 avoids the multi-pass f32 emulation on the MXU)
        y = y + jnp.dot(w_ref[...].astype(jnp.bfloat16),
                        x.astype(jnp.bfloat16),
                        preferred_element_type=jnp.float32)
    else:
        # tiny channel counts: pure-f32 VPU outer-product accumulate
        w = w_ref[...]                  # (out_c, in_c)
        in_c = x_ref.shape[1]
        for i in range(in_c):
            y = y + w[:, i:i + 1] * x[i:i + 1, :]

    o_ref[0] = jnp.maximum(y, 0.0).astype(o_ref.dtype)


def bypass_add_act(x2d, xspec2d, w, b, *, max_lane_tile=4096):
    B, in_c, S = x2d.shape
    out_c = w.shape[0]

    budget, vmem_limit = _vmem_budget()
    # x, x_spec, out double-buffered; bias tile counted once
    per_lane_bytes = 4 * 2 * (in_c + 2 * out_c) + 4 * out_c
    ts, S_pad = _pick_lane_tile(S, max_lane_tile, per_lane_bytes, budget)

    # S is usually already a multiple of 128 (e.g. 64x64, 128x128 grids); if
    # not, pad by at most 127 lanes (cheap) and slice the result back.
    if S_pad != S:
        pad = ((0, 0), (0, 0), (0, S_pad - S))
        x2d = jnp.pad(x2d, pad)
        xspec2d = jnp.pad(xspec2d, pad)

    # lane-dense bias tile, constant index map -> loaded once
    b_tile = jnp.broadcast_to(b.reshape(out_c, 1), (out_c, ts))

    n_s = S_pad // ts
    use_mxu = min(in_c, out_c) >= 32

    flops = 2 * B * out_c * in_c * S_pad + 3 * B * out_c * S_pad
    bytes_accessed = 4 * (B * in_c * S_pad + 2 * B * out_c * S_pad
                          + out_c * in_c + out_c * ts)

    # TODO(synk): optionally stream x2d / output as bf16 (f32 accumulate) to
    # cut HBM traffic ~25-40%; kept f32 here to match the reference exactly.
    out = pl.pallas_call(
        functools.partial(bypass_act_kernel, use_mxu=use_mxu),
        out_shape=jax.ShapeDtypeStruct((B, out_c, S_pad), jnp.float32),
        grid=(B, n_s),
        in_specs=[
            pl.BlockSpec((1, in_c, ts), lambda bi, si: (bi, 0, si)),
            pl.BlockSpec((1, out_c, ts), lambda bi, si: (bi, 0, si)),
            pl.BlockSpec((out_c, in_c), lambda bi, si: (0, 0)),
            pl.BlockSpec((out_c, ts), lambda bi, si: (0, 0)),
        ],
        out_specs=pl.BlockSpec((1, out_c, ts), lambda bi, si: (bi, 0, si)),
        compiler_params=pltpu.CompilerParams(
            dimension_semantics=("parallel", "parallel"),
            vmem_limit_bytes=vmem_limit),
        cost_estimate=pl.CostEstimate(flops=flops, transcendentals=0,
                                      bytes_accessed=bytes_accessed),
    )(x2d, xspec2d, w, b_tile)

    return out[:, :, :S] if S_pad != S else out


# ---------------------------------------------------------------------------
# parameter prep (done once, outside the per-call path)
# ---------------------------------------------------------------------------
def prepare_spectral_weights(spec_wr, spec_wi, modes):
    """Flatten the mode dims to one lane axis and pad to a multiple of 128."""
    in_c, out_c = spec_wr.shape[:2]
    M = int(np.prod(modes))
    M_pad = max(128, _round_up(M, 128))
    wr = spec_wr.reshape(in_c, out_c, M).astype(jnp.float32)
    wi = spec_wi.reshape(in_c, out_c, M).astype(jnp.float32)
    if M_pad != M:
        pad = ((0, 0), (0, 0), (0, M_pad - M))
        wr = jnp.pad(wr, pad)
        wi = jnp.pad(wi, pad)
    return wr, wi


# ---------------------------------------------------------------------------
# FNO block forward (2-D case: modes = [m1, m2])
# ---------------------------------------------------------------------------
def fno_block_forward(x, wr_pad, wi_pad, conv_w, conv_b, modes):
    B, in_c, H, W = x.shape
    out_c = wr_pad.shape[1]
    m1, m2 = modes

    # --- spectral branch ---------------------------------------------------
    # TODO(synk): rfftn/irfftn have no Pallas primitive; they stay in XLA.
    x_fft = jnp.fft.rfftn(x, axes=(-2, -1), norm="ortho")     # (B,in_c,H,W//2+1)
    x_fft = x_fft[:, :, :m1, :m2]                              # keep low modes

    M = m1 * m2
    xr = jnp.real(x_fft).reshape(B, in_c, M).astype(jnp.float32)
    xi = jnp.imag(x_fft).reshape(B, in_c, M).astype(jnp.float32)

    or_, oi_ = spectral_mul(xr, xi, wr_pad, wi_pad)            # (B,out_c,M) x2
    out_fft = (or_ + 1j * oi_).astype(jnp.complex64).reshape(B, out_c, m1, m2)

    x_spec = jnp.fft.irfftn(out_fft, s=(H, W), axes=(-2, -1), norm="ortho")
    x_spec = x_spec.astype(jnp.float32)                        # (B,out_c,H,W)

    # --- bypass (1x1 conv) + bias + residual + ReLU, fused ------------------
    S = H * W
    y2d = bypass_add_act(
        x.reshape(B, in_c, S).astype(jnp.float32),
        x_spec.reshape(B, out_c, S),
        conv_w.astype(jnp.float32),
        conv_b.reshape(out_c).astype(jnp.float32),
    )
    return y2d.reshape(B, out_c, H, W)


# ---------------------------------------------------------------------------
# Pure-JAX reference (mirrors the PyTorch forward exactly) for validation
# ---------------------------------------------------------------------------
def fno_block_reference(x, spec_wr, spec_wi, conv_w, conv_b, modes):
    m1, m2 = modes
    B, in_c, H, W = x.shape
    weight = spec_wr + 1j * spec_wi                            # (in_c,out_c,m1,m2)
    x_fft = jnp.fft.rfftn(x, axes=(-2, -1), norm="ortho")[:, :, :m1, :m2]
    out_fft = jnp.einsum("bixy,ioxy->boxy", x_fft, weight)
    x_spec = jnp.fft.irfftn(out_fft, s=(H, W), axes=(-2, -1), norm="ortho")
    bypass = jnp.einsum("oi,bihw->bohw", conv_w, x) + conv_b.reshape(1, -1, 1, 1)
    return jnp.maximum(x_spec + bypass, 0.0)


if __name__ == "__main__":
    # Small deterministic 2-D FNO block: batch=2, in_c=4, out_c=4,
    # spatial 16x16, modes [4, 4].
    B, in_c, out_c, H, W = 2, 4, 4, 16, 16
    modes = [4, 4]

    key = jax.random.PRNGKey(0)
    k_x, k_wr, k_wi, k_cw, k_cb = jax.random.split(key, 5)

    x = jax.random.normal(k_x, (B, in_c, H, W), dtype=jnp.float32)

    # Spectral weight: torch does randn(cfloat) * 2*scale - scale; (-scale)
    # only affects the real part.
    scale = 1.0 / (in_c * out_c)
    spec_wr = (jax.random.normal(k_wr, (in_c, out_c, *modes), jnp.float32)
               * 2.0 * scale - scale)
    spec_wi = (jax.random.normal(k_wi, (in_c, out_c, *modes), jnp.float32)
               * 2.0 * scale)

    # 1x1 Conv2d params: weight (out_c, in_c), bias (out_c,)
    bound = 1.0 / np.sqrt(in_c)
    conv_w = jax.random.uniform(k_cw, (out_c, in_c), jnp.float32, -bound, bound)
    conv_b = jax.random.uniform(k_cb, (out_c,), jnp.float32, -bound, bound)

    # pad/flatten spectral weights once (hoisted out of the per-call path)
    wr_pad, wi_pad = prepare_spectral_weights(spec_wr, spec_wi, modes)

    out = fno_block_forward(x, wr_pad, wi_pad, conv_w, conv_b, modes)
    out = jax.block_until_ready(out)

    ref = fno_block_reference(x, spec_wr, spec_wi, conv_w, conv_b, modes)
    ref = jax.block_until_ready(ref)

    assert out.shape == (B, out_c, H, W)
    np.testing.assert_allclose(np.asarray(out), np.asarray(ref),
                               rtol=1e-3, atol=1e-3)
    print("KERNEL_OK")
</pallas_src>

<mosaic_0001>
module attributes {stable_mosaic.version = 11 : i64} {
  func.func @spectral_mul_kernel(%arg0: i32, %arg1: i32, %arg2: memref<1x4x128xf32, #tpu.memory_space<vmem>>, %arg3: memref<1x4x128xf32, #tpu.memory_space<vmem>>, %arg4: memref<4x4x128xf32, #tpu.memory_space<vmem>>, %arg5: memref<4x4x128xf32, #tpu.memory_space<vmem>>, %arg6: memref<1x4x128xf32, #tpu.memory_space<vmem>>, %arg7: memref<1x4x128xf32, #tpu.memory_space<vmem>>) attributes {dimension_semantics = [#tpu.dimension_semantics<parallel>, #tpu.dimension_semantics<parallel>], iteration_bounds = array<i64: 1, 2>, scalar_prefetch = 0 : i64, scratch_operands = 0 : i64, tpu.core_type = #tpu.core_type<tc>, window_params = [{transform_indices = @transform_0, window_bounds = array<i64: 1, 4, 128>}, {transform_indices = @transform_1, window_bounds = array<i64: 1, 4, 128>}, {transform_indices = @transform_2, window_bounds = array<i64: 4, 4, 128>}, {transform_indices = @transform_3, window_bounds = array<i64: 4, 4, 128>}, {transform_indices = @transform_4, window_bounds = array<i64: 1, 4, 128>}, {transform_indices = @transform_5, window_bounds = array<i64: 1, 4, 128>}]} {
    %cst = arith.constant 0.000000e+00 : f32
    %0 = vector.broadcast %cst : f32 to vector<4x128xf32>
    %cst_0 = arith.constant 0.000000e+00 : f32
    %1 = vector.broadcast %cst_0 : f32 to vector<4x128xf32>
    %c0 = arith.constant 0 : index
    %c0_1 = arith.constant 0 : index
    %c0_2 = arith.constant 0 : index
    %2 = vector.load %arg2[%c0, %c0_1, %c0_2] : memref<1x4x128xf32, #tpu.memory_space<vmem>>, vector<1x1x128xf32>
    %3 = vector.shape_cast %2 : vector<1x1x128xf32> to vector<1x128xf32>
    %c0_3 = arith.constant 0 : index
    %c0_4 = arith.constant 0 : index
    %c0_5 = arith.constant 0 : index
    %4 = vector.load %arg3[%c0_3, %c0_4, %c0_5] : memref<1x4x128xf32, #tpu.memory_space<vmem>>, vector<1x1x128xf32>
    %5 = vector.shape_cast %4 : vector<1x1x128xf32> to vector<1x128xf32>
    %c0_6 = arith.constant 0 : index
    %c0_7 = arith.constant 0 : index
    %c0_8 = arith.constant 0 : index
    %6 = vector.load %arg4[%c0_6, %c0_7, %c0_8] : memref<4x4x128xf32, #tpu.memory_space<vmem>>, vector<1x4x128xf32>
    %7 = vector.shape_cast %6 : vector<1x4x128xf32> to vector<4x128xf32>
    %c0_9 = arith.constant 0 : index
    %c0_10 = arith.constant 0 : index
    %c0_11 = arith.constant 0 : index
    %8 = vector.load %arg5[%c0_9, %c0_10, %c0_11] : memref<4x4x128xf32, #tpu.memory_space<vmem>>, vector<1x4x128xf32>
    %9 = vector.shape_cast %8 : vector<1x4x128xf32> to vector<4x128xf32>
    %10 = vector.broadcast %3 : vector<1x128xf32> to vector<4x128xf32>
    %11 = arith.mulf %10, %7 : vector<4x128xf32>
    %12 = arith.addf %0, %11 : vector<4x128xf32>
    %13 = vector.broadcast %5 : vector<1x128xf32> to vector<4x128xf32>
    %14 = arith.mulf %13, %9 : vector<4x128xf32>
    %15 = arith.subf %12, %14 : vector<4x128xf32>
    %16 = vector.broadcast %3 : vector<1x128xf32> to vector<4x128xf32>
    %17 = arith.mulf %16, %9 : vector<4x128xf32>
    %18 = arith.addf %1, %17 : vector<4x128xf32>
    %19 = vector.broadcast %5 : vector<1x128xf32> to vector<4x128xf32>
    %20 = arith.mulf %19, %7 : vector<4x128xf32>
    %21 = arith.addf %18, %20 : vector<4x128xf32>
    %c0_12 = arith.constant 0 : index
    %c1 = arith.constant 1 : index
    %c0_13 = arith.constant 0 : index
    %22 = vector.load %arg2[%c0_12, %c1, %c0_13] : memref<1x4x128xf32, #tpu.memory_space<vmem>>, vector<1x1x128xf32>
    %23 = vector.shape_cast %22 : vector<1x1x128xf32> to vector<1x128xf32>
    %c0_14 = arith.constant 0 : index
    %c1_15 = arith.constant 1 : index
    %c0_16 = arith.constant 0 : index
    %24 = vector.load %arg3[%c0_14, %c1_15, %c0_16] : memref<1x4x128xf32, #tpu.memory_space<vmem>>, vector<1x1x128xf32>
    %25 = vector.shape_cast %24 : vector<1x1x128xf32> to vector<1x128xf32>
    %c1_17 = arith.constant 1 : index
    %c0_18 = arith.constant 0 : index
    %c0_19 = arith.constant 0 : index
    %26 = vector.load %arg4[%c1_17, %c0_18, %c0_19] : memref<4x4x128xf32, #tpu.memory_space<vmem>>, vector<1x4x128xf32>
    %27 = vector.shape_cast %26 : vector<1x4x128xf32> to vector<4x128xf32>
    %c1_20 = arith.constant 1 : index
    %c0_21 = arith.constant 0 : index
    %c0_22 = arith.constant 0 : index
    %28 = vector.load %arg5[%c1_20, %c0_21, %c0_22] : memref<4x4x128xf32, #tpu.memory_space<vmem>>, vector<1x4x128xf32>
    %29 = vector.shape_cast %28 : vector<1x4x128xf32> to vector<4x128xf32>
    %30 = vector.broadcast %23 : vector<1x128xf32> to vector<4x128xf32>
    %31 = arith.mulf %30, %27 : vector<4x128xf32>
    %32 = arith.addf %15, %31 : vector<4x128xf32>
    %33 = vector.broadcast %25 : vector<1x128xf32> to vector<4x128xf32>
    %34 = arith.mulf %33, %29 : vector<4x128xf32>
    %35 = arith.subf %32, %34 : vector<4x128xf32>
    %36 = vector.broadcast %23 : vector<1x128xf32> to vector<4x128xf32>
    %37 = arith.mulf %36, %29 : vector<4x128xf32>
    %38 = arith.addf %21, %37 : vector<4x128xf32>
    %39 = vector.broadcast %25 : vector<1x128xf32> to vector<4x128xf32>
    %40 = arith.mulf %39, %27 : vector<4x128xf32>
    %41 = arith.addf %38, %40 : vector<4x128xf32>
    %c0_23 = arith.constant 0 : index
    %c2 = arith.constant 2 : index
    %c0_24 = arith.constant 0 : index
    %42 = vector.load %arg2[%c0_23, %c2, %c0_24] : memref<1x4x128xf32, #tpu.memory_space<vmem>>, vector<1x1x128xf32>
    %43 = vector.shape_cast %42 : vector<1x1x128xf32> to vector<1x128xf32>
    %c0_25 = arith.constant 0 : index
    %c2_26 = arith.constant 2 : index
    %c0_27 = arith.constant 0 : index
    %44 = vector.load %arg3[%c0_25, %c2_26, %c0_27] : memref<1x4x128xf32, #tpu.memory_space<vmem>>, vector<1x1x128xf32>
    %45 = vector.shape_cast %44 : vector<1x1x128xf32> to vector<1x128xf32>
    %c2_28 = arith.constant 2 : index
    %c0_29 = arith.constant 0 : index
    %c0_30 = arith.constant 0 : index
    %46 = vector.load %arg4[%c2_28, %c0_29, %c0_30] : memref<4x4x128xf32, #tpu.memory_space<vmem>>, vector<1x4x128xf32>
    %47 = vector.shape_cast %46 : vector<1x4x128xf32> to vector<4x128xf32>
    %c2_31 = arith.constant 2 : index
    %c0_32 = arith.constant 0 : index
    %c0_33 = arith.constant 0 : index
    %48 = vector.load %arg5[%c2_31, %c0_32, %c0_33] : memref<4x4x128xf32, #tpu.memory_space<vmem>>, vector<1x4x128xf32>
    %49 = vector.shape_cast %48 : vector<1x4x128xf32> to vector<4x128xf32>
    %50 = vector.broadcast %43 : vector<1x128xf32> to vector<4x128xf32>
    %51 = arith.mulf %50, %47 : vector<4x128xf32>
    %52 = arith.addf %35, %51 : vector<4x128xf32>
    %53 = vector.broadcast %45 : vector<1x128xf32> to vector<4x128xf32>
    %54 = arith.mulf %53, %49 : vector<4x128xf32>
    %55 = arith.subf %52, %54 : vector<4x128xf32>
    %56 = vector.broadcast %43 : vector<1x128xf32> to vector<4x128xf32>
    %57 = arith.mulf %56, %49 : vector<4x128xf32>
    %58 = arith.addf %41, %57 : vector<4x128xf32>
    %59 = vector.broadcast %45 : vector<1x128xf32> to vector<4x128xf32>
    %60 = arith.mulf %59, %47 : vector<4x128xf32>
    %61 = arith.addf %58, %60 : vector<4x128xf32>
    %c0_34 = arith.constant 0 : index
    %c3 = arith.constant 3 : index
    %c0_35 = arith.constant 0 : index
    %62 = vector.load %arg2[%c0_34, %c3, %c0_35] : memref<1x4x128xf32, #tpu.memory_space<vmem>>, vector<1x1x128xf32>
    %63 = vector.shape_cast %62 : vector<1x1x128xf32> to vector<1x128xf32>
    %c0_36 = arith.constant 0 : index
    %c3_37 = arith.constant 3 : index
    %c0_38 = arith.constant 0 : index
    %64 = vector.load %arg3[%c0_36, %c3_37, %c0_38] : memref<1x4x128xf32, #tpu.memory_space<vmem>>, vector<1x1x128xf32>
    %65 = vector.shape_cast %64 : vector<1x1x128xf32> to vector<1x128xf32>
    %c3_39 = arith.constant 3 : index
    %c0_40 = arith.constant 0 : index
    %c0_41 = arith.constant 0 : index
    %66 = vector.load %arg4[%c3_39, %c0_40, %c0_41] : memref<4x4x128xf32, #tpu.memory_space<vmem>>, vector<1x4x128xf32>
    %67 = vector.shape_cast %66 : vector<1x4x128xf32> to vector<4x128xf32>
    %c3_42 = arith.constant 3 : index
    %c0_43 = arith.constant 0 : index
    %c0_44 = arith.constant 0 : index
    %68 = vector.load %arg5[%c3_42, %c0_43, %c0_44] : memref<4x4x128xf32, #tpu.memory_space<vmem>>, vector<1x4x128xf32>
    %69 = vector.shape_cast %68 : vector<1x4x128xf32> to vector<4x128xf32>
    %70 = vector.broadcast %63 : vector<1x128xf32> to vector<4x128xf32>
    %71 = arith.mulf %70, %67 : vector<4x128xf32>
    %72 = arith.addf %55, %71 : vector<4x128xf32>
    %73 = vector.broadcast %65 : vector<1x128xf32> to vector<4x128xf32>
    %74 = arith.mulf %73, %69 : vector<4x128xf32>
    %75 = arith.subf %72, %74 : vector<4x128xf32>
    %76 = vector.broadcast %63 : vector<1x128xf32> to vector<4x128xf32>
    %77 = arith.mulf %76, %69 : vector<4x128xf32>
    %78 = arith.addf %61, %77 : vector<4x128xf32>
    %79 = vector.broadcast %65 : vector<1x128xf32> to vector<4x128xf32>
    %80 = arith.mulf %79, %67 : vector<4x128xf32>
    %81 = arith.addf %78, %80 : vector<4x128xf32>
    %c0_45 = arith.constant 0 : index
    %c0_46 = arith.constant 0 : index
    %c0_47 = arith.constant 0 : index
    %82 = vector.load %arg6[%c0_45, %c0_46, %c0_47] : memref<1x4x128xf32, #tpu.memory_space<vmem>>, vector<1x4x128xf32>
    %83 = vector.shape_cast %82 : vector<1x4x128xf32> to vector<4x128xf32>
    %84 = vector.shape_cast %75 : vector<4x128xf32> to vector<1x4x128xf32>
    tpu.vector_store %arg6[%c0_45, %c0_46, %c0_47], %84 {strides = array<i32>} : memref<1x4x128xf32, #tpu.memory_space<vmem>>, vector<1x4x128xf32>,
    %c0_48 = arith.constant 0 : index
    %c0_49 = arith.constant 0 : index
    %c0_50 = arith.constant 0 : index
    %85 = vector.load %arg7[%c0_48, %c0_49, %c0_50] : memref<1x4x128xf32, #tpu.memory_space<vmem>>, vector<1x4x128xf32>
    %86 = vector.shape_cast %85 : vector<1x4x128xf32> to vector<4x128xf32>
    %87 = vector.shape_cast %81 : vector<4x128xf32> to vector<1x4x128xf32>
    tpu.vector_store %arg7[%c0_48, %c0_49, %c0_50], %87 {strides = array<i32>} : memref<1x4x128xf32, #tpu.memory_space<vmem>>, vector<1x4x128xf32>,
    return
  }
  func.func @transform_0(%arg0: i32, %arg1: i32) -> (i32, i32, i32) {
    %c0_i32 = arith.constant 0 : i32
    %c0_i32_0 = arith.constant 0 : i32
    return %arg1, %c0_i32, %arg0 : i32, i32, i32
  }
  func.func @transform_1(%arg0: i32, %arg1: i32) -> (i32, i32, i32) {
    %c0_i32 = arith.constant 0 : i32
    %c0_i32_0 = arith.constant 0 : i32
    return %arg1, %c0_i32, %arg0 : i32, i32, i32
  }
  func.func @transform_2(%arg0: i32, %arg1: i32) -> (i32, i32, i32) {
    %c0_i32 = arith.constant 0 : i32
    %c0_i32_0 = arith.constant 0 : i32
    %c0_i32_1 = arith.constant 0 : i32
    return %c0_i32, %c0_i32_0, %arg0 : i32, i32, i32
  }
  func.func @transform_3(%arg0: i32, %arg1: i32) -> (i32, i32, i32) {
    %c0_i32 = arith.constant 0 : i32
    %c0_i32_0 = arith.constant 0 : i32
    %c0_i32_1 = arith.constant 0 : i32
    return %c0_i32, %c0_i32_0, %arg0 : i32, i32, i32
  }
  func.func @transform_4(%arg0: i32, %arg1: i32) -> (i32, i32, i32) {
    %c0_i32 = arith.constant 0 : i32
    %c0_i32_0 = arith.constant 0 : i32
    return %arg1, %c0_i32, %arg0 : i32, i32, i32
  }
  func.func @transform_5(%arg0: i32, %arg1: i32) -> (i32, i32, i32) {
    %c0_i32 = arith.constant 0 : i32
    %c0_i32_0 = arith.constant 0 : i32
    return %arg1, %c0_i32, %arg0 : i32, i32, i32
  }
}

</mosaic_0001>

<bundles_post_ra>
// kernel: tpu_custom_call.1
= control target key start
LH: loop header
LB: loop body
LE: loop exit
PB: predicated region body
PF: predicated region fallthrough
CT: control target
= control target key end

     0   :  { %s1234_s0 = inlined_call_operand.hbm [shape: f32[2,4,128], index: 0, kind: input, shape index: {}]   ;;  %s1235_s1 = inlined_call_operand.hbm [shape: f32[2,4,128], index: 1, kind: input, shape index: {}]   ;;  %s1236_s2 = inlined_call_operand.hbm [shape: f32[4,4,128], index: 2, kind: input, shape index: {}]   ;;  %s1237_s3 = inlined_call_operand.hbm [shape: f32[4,4,128], index: 3, kind: input, shape index: {}]   ;;  %s1238_s4 = inlined_call_operand.hbm [shape: f32[2,4,128], index: 4, kind: output, shape index: {0}]   ;;  %s1239_s5 = inlined_call_operand.hbm [shape: f32[2,4,128], index: 5, kind: output, shape index: {1}]  }
   0x1   :  { %1243 = sst [smem:[#allocation23_spill]] %s1236_s2 }
   0x2   :  { %1244 = sst [smem:[#allocation24_spill]] %s1237_s3 }
   0x3   :  { %11 = vsyncpa [#allocation3], 0 }
   0x4   :  { %13 = vsyncpa [#allocation3 + $0x1], 0 }
   0x5   :  { %14 = vsyncpa [#allocation6], 0 }
   0x6   :  { %16 = vsyncpa [#allocation6 + $0x1], 0 }
   0x7   :  { %17 = vsyncpa [#allocation9], 0 }
   0x8   :  { %18 = vsyncpa [#allocation4], 0 }
   0x9   :  { %20 = vsyncpa [#allocation4 + $0x1], 0 }
   0xa   :  { %21 = vsyncpa [#allocation12], 0 }
   0xb   :  { %23 = vsyncpa [#allocation12 + $0x1], 0  ;;  %s1031_s18 = smov 0   ;;  %s1033_s19 = smov 0  }
   0xc   :  { %s1035_s20 = smov 0   ;;  %s1037_s21 = smov 0  }
   0xd   :  { %s1039_s22 = smov 0   ;;  %s1041_s23 = smov 0  }
   0xe LB: > { %1245 = sst [smem:[#allocation19_spill]] %s983_s20  ;;  %s1062_s24 = sadd.s32 4294967295, %s995_s23   ;;  %s995_s23 = sphi %s1041_s23, %s29_s23   ;;  %s991_s22 = sphi %s1039_s22, %s1259_s22   ;;  %s987_s21 = sphi %s1037_s21, %s1258_s21   ;;  %s983_s20 = sphi %s1035_s20, %s1257_s20   ;;  %s979_s19 = sphi %s1033_s19, %s1261_s19   ;;  %s975_s18 = sphi %s1031_s18, %s1260_s18  }
   0xf   : > { %1246 = sst [smem:[#allocation20_spill]] %s991_s22  ;;  %p625_p0 = scmp.ge.s32.totalorder %s995_s23, 1 }
  0x10   : > { %p64_p1 = scmp.eq.s32.totalorder %s1062_s24, 0  ;;  %p210_p2 = scmp.lt.s32.totalorder %s995_s23, 3 }
  0x11   : > { %s1247_s2 = sld [smem:[#allocation23_spill]]  ;;  %s997_s29 = smov [#allocation7]  }
  0x12   : > { %p1070_p3 = pnand %p625_p0, %p210_p2  ;;  %s225_s30 = sshll.u32 %s997_s29, 4  ;;  %s226_s30 = int_to_ptr.vmem [resolvable:$true] %s225_s30 }
  0x13   : > { %p628_p6 = scmp.ge.s32.totalorder %s995_s23, 2  ;;  %s1249_s3 = sld [smem:[#allocation24_spill]] }
  0x14   : > { %p662_p4 = pneg %p1070_p3  ;;  %s998_s9 = smov 64  }
  0x15   : > { %s999_s10 = smov 4   ;;  %s1000_s11 = smov [#allocation8]  }
  0x16   : > { %p663_p5 = pnand %p662_p4, %p64_p1  ;;  %s241_s12 = sshll.u32 %s1000_s11, 4  ;;  %s242_s12 = int_to_ptr.vmem [resolvable:$true] %s241_s12 }
  0x17   : > { %s223_s27 = sshll.u32 %s1247_s2, 4  ;;  %s624_s13 = sadd.s32 4294967294, %s995_s23   ;;  %s224_s27 = int_to_ptr.hbm [resolvable:$true] %s223_s27 }
  0x18   : > { %665 = dma.hbm_to_vmem [thread:$0]  (!%p663_p5), %s224_s27, 256, %s226_s30, [#allocation6], %s998_s9, %s998_s9, %s999_s10  }
  0x19   : > { %s239_s8 = sshll.u32 %s1249_s3, 4  ;;  %s38_s14 = sadd.s32 1, %s991_s22  ;;  %s240_s8 = int_to_ptr.hbm [resolvable:$true] %s239_s8 }
  0x1a   : > { %668 = dma.hbm_to_vmem [thread:$0]  (!%p663_p5), %s240_s8, 256, %s242_s12, [#allocation9], %s998_s9, %s998_s9, %s999_s10  }
  0x1b   : > { %p39_p7 = scmp.ge.s32.totalorder %s38_s14, 2  ;;  %s50_s15 = sadd.s32 1, %s983_s20 }
  0x1c   : > { %p57_p8 = scmp.ne.s32.totalorder %s983_s20, %s979_s19  ;;  %p58_p9 = scmp.eq.s32.totalorder %s995_s23, 0 }
  0x1d   : > { %s1263_s14 = smov (%p39_p7, %s38_s14), 0  ;;  %p63_p11 = scmp.ne.s32.totalorder %s979_s19, %s975_s18 }
  0x1e   : > { %1250 = sst [smem:[#allocation21_spill]] %s1263_s14  ;;  %p1090_p10 = por %p58_p9, %p57_p8 }
  0x1f   : > { %s45_s17 = ssub.s32 %s991_s22, %s1263_s14  ;;  %p169_p12 = scmp.eq.s32.totalorder %s1062_s24, 1 }
  0x20   : > { %p48_p13 = scmp.eq.s32.totalorder %s45_s17, 0  ;;  %p1101_p0 = por %p64_p1, %p63_p11 }
  0x21   : > { %p1105_p2 = por %p169_p12, %p57_p8  ;;  %p175_p4 = scmp.eq.s32.totalorder %s624_s13, 1 }
  0x22   : > { %s1110_s27 = scalar_select %p48_p13, %s983_s20, %s50_s15  }
  0x23   : > { %p1112_p5 = por %p175_p4, %p63_p11  ;;  %p685_p7 = scmp.lt.s32.totalorder %s995_s23, 2 }
  0x24   : > { %1254 = sst [smem:[#allocation22_spill]] %s1110_s27  ;;  %s255_s30 = sand.u32 1, %s983_s20  }
  0x25   : > { %s630_s6 = sshll.u32 %s991_s22, 2  ;;  %s629_s7 = sshll.u32 %s255_s30, 2 }
  0x26   : > { %s264_s10 = scalar_lea.hbm %s1234_s0, %s630_s6  ;;  %s259_s12 = scalar_lea.vmem [#allocation2], %s629_s7 }
  0x27   : > { %s266_s11 = sshll.u32 %s264_s10, 4  ;;  %s268_s17 = sshll.u32 %s259_s12, 4  ;;  %s267_s11 = int_to_ptr.hbm [resolvable:$true] %s266_s11  ;;  %s269_s17 = int_to_ptr.vmem [resolvable:$true] %s268_s17 }
  0x28   : > { %p670_p8 = pnand %p685_p7, %p1090_p10  ;;  %s284_s2 = scalar_lea.hbm %s1235_s1, %s630_s6 }
  0x29   : > { %s275_s3 = sand.u32 1, %s995_s23   ;;  %s256_s14 = scalar_lea.sflag [#allocation3], %s255_s30 }
  0x2a   : > { %672 = dma.hbm_to_vmem [thread:$0]  (!%p670_p8), %s267_s11, 64, %s269_s17, %s256_s14  }
  0x2b   : > { %s286_s22 = sshll.u32 %s284_s2, 4  ;;  %s279_s27 = scalar_lea.vmem [#allocation5], %s629_s7  ;;  %s287_s22 = int_to_ptr.hbm [resolvable:$true] %s286_s22 }
  0x2c   : > { %s288_s20 = sshll.u32 %s279_s27, 4  ;;  %s276_s8 = scalar_lea.sflag [#allocation6], %s275_s3  ;;  %s289_s20 = int_to_ptr.vmem [resolvable:$true] %s288_s20 }
  0x2d   : > { %675 = dma.hbm_to_vmem [thread:$0]  (!%p670_p8), %s287_s22, 64, %s289_s20, %s276_s8  }
  0x2e   : > { %297 = sbr.rel (%p1070_p3) target bundleno = 93 (0x5d), region = 36  ;;  %s1131_s16 = sand.u32 (!%p1070_p3), 1, %s979_s19  }
  0x2f   : > { %s1134_s6 = sshll.u32 (!%p1070_p3), %s1131_s16, 2  ;;  %s300_s14 = scalar_lea.sflag (!%p1070_p3), [#allocation3], %s1131_s16 }
  0x30   : > { %s1138_s2 = scalar_lea.vmem (!%p1070_p3), [#allocation2], %s1134_s6 }
  0x33   : > { %950 = dma.done.wait (%p1101_p0), %s300_s14, 64  }
  0x34   : > { %952 = vsyncadd (%p1101_p0), %s300_s14, 4294967232  ;;  %s309_s3 = sand.u32 1, %s1062_s24   ;;  %s1146_s22 = scalar_lea.vmem [#allocation5], %s1134_s6 }
  0x35   : > { %s310_s20 = scalar_lea.sflag [#allocation6], %s309_s3 }
  0x36   : > { %954 = dma.done.wait (%p1101_p0), %s310_s20, 64  }
  0x37   : > { %956 = vsyncadd (%p1101_p0), %s310_s20, 4294967232 }
  0x38   : > { %958 = dma.done.wait (%p64_p1), [#allocation6], 256  }
  0x39   : > { %960 = vsyncadd (%p64_p1), [#allocation6], 4294967040 }
  0x3a   : > { %962 = dma.done.wait (%p64_p1), [#allocation9], 256  }
  0x3b   : > { %964 = vsyncadd (%p64_p1), [#allocation9], 4294967040  ;;  %v363_v0 = vld [vmem:[#allocation7] sm:$0xf]  ;;  %v364_v1 = vld [vmem:[#allocation8] sm:$0xf] }
  0x3c   : > { %v741_v2 = vld [vmem:[%s1138_s2] ss:$0 sm:$0xff]  ;;  %v742_v3 = vld [vmem:[%s1146_s22] ss:$0 sm:$0xff]  ;;  %v378_v4 = vld [vmem:[#allocation7 + $0x4] sm:$0xf] }
  0x3d   : > { %v366_v5 = vmul.f32 %v741_v2, %v363_v0  ;;  %v369_v6 = vmul.f32 %v742_v3, %v364_v1  ;;  %v380_v7 = vld [vmem:[#allocation8 + $0x4] sm:$0xf]  ;;  %v744_v9 = vld [vmem:[%s1146_s22 + $0x1] ss:$0 sm:$0xff]  ;;  %v371_v10 = vmul.f32 %v741_v2, %v364_v1  ;;  %v373_v11 = vmul.f32 %v742_v3, %v363_v0  ;;  %v394_v12 = vld [vmem:[#allocation7 + $0x8] sm:$0xf] }
  0x3e   : > { %v743_v8 = vld [vmem:[%s1138_s2 + $0x1] ss:$0 sm:$0xff]  ;;  %v385_v15 = vmul.f32 %v744_v9, %v380_v7  ;;  %v396_v16 = vld [vmem:[#allocation8 + $0x8] sm:$0xf]  ;;  %v745_v17 = vld [vmem:[%s1138_s2 + $0x2] ss:$0 sm:$0xff]  ;;  %v389_v21 = vmul.f32 %v744_v9, %v378_v4 }
  0x3f   : > { %v370_v13 = vsub.f32 %v366_v5, %v369_v6  ;;  %v382_v14 = vmul.f32 %v743_v8, %v378_v4  ;;  %v746_v18 = vld [vmem:[%s1146_s22 + $0x2] ss:$0 sm:$0xff]  ;;  %v374_v19 = vadd.f32 %v373_v11, %v371_v10  ;;  %v387_v20 = vmul.f32 %v743_v8, %v380_v7  ;;  %v747_v24 = vld [vmem:[%s1138_s2 + $0x3] ss:$0 sm:$0xff]  ;;  %v410_v25 = vld [vmem:[#allocation7 + $0xc] sm:$0xf] }
  0x40   : > { %v398_v23 = vmul.f32 %v745_v17, %v394_v12  ;;  %v403_v27 = vmul.f32 %v745_v17, %v396_v16  ;;  %s642_s24 = sshll.u32 %s987_s21, 2  ;;  %v401_v29 = vmul.f32 %v746_v18, %v396_v16  ;;  %v412_v30 = vld [vmem:[#allocation8 + $0xc] sm:$0xf]  ;;  %v405_v33 = vmul.f32 %v746_v18, %v394_v12  ;;  %s353_s21 = scalar_lea.vmem [#allocation10], %s1134_s6 }
  0x41   : > { %v383_v22 = vadd.f32 %v382_v14, %v370_v13  ;;  %v388_v26 = vadd.f32 %v387_v20, %v374_v19  ;;  %v748_v31 = vld [vmem:[%s1146_s22 + $0x3] ss:$0 sm:$0xff]  ;;  %v414_v35 = vmul.f32 %v747_v24, %v410_v25  ;;  %s442_s27 = scalar_lea.hbm %s1238_s4, %s642_s24  ;;  %v419_v37 = vmul.f32 %v747_v24, %v412_v30  ;;  %s457_s9 = scalar_lea.hbm %s1239_s5, %s642_s24 }
  0x42   : > { %v417_v39 = vmul.f32 %v748_v31, %v412_v30  ;;  %s1176_s10 = sshll.u32 %s353_s21, 4  ;;  %s360_s11 = scalar_lea.vmem [#allocation11], %s1134_s6  ;;  %v421_v41 = vmul.f32 %v748_v31, %v410_v25  ;;  %s445_s10 = int_to_ptr.vmem [resolvable:$true] %s1176_s10 }
  0x43   : > { %v386_v28 = vsub.f32 %v383_v22, %v385_v15  ;;  %v390_v32 = vadd.f32 %v389_v21, %v388_v26  ;;  %s1179_s12 = sshll.u32 %s360_s11, 4  ;;  %s446_s17 = sshll.u32 %s442_s27, 4  ;;  %s460_s12 = int_to_ptr.vmem [resolvable:$true] %s1179_s12  ;;  %s447_s17 = int_to_ptr.hbm [resolvable:$true] %s446_s17 }
  0x44   : > { %s461_s13 = sshll.u32 %s457_s9, 4  ;;  %s426_s15 = scalar_lea.sflag [#allocation4], %s1131_s16  ;;  %s1183_s13 = int_to_ptr.hbm [resolvable:$true] %s461_s13 }
  0x45   : > { %v399_v34 = vadd.f32 %v398_v23, %v386_v28  ;;  %v404_v36 = vadd.f32 %v403_v27, %v390_v32  ;;  %s883_s8 = sshra.s32 %s447_s17, 4  ;;  %s889_s3 = scalar_lea.hbm %s1238_s4, 8  ;;  %s884_s8 = int_to_ptr.hbm [resolvable:$true] %s883_s8 }
  0x46   : > { %s885_s6 = scalar_lea.hbm %s884_s8, 4  ;;  %p890_p10 = scmp.lt.s32.totalorder %s884_s8, %s1238_s4 }
  0x47   : > { %v402_v38 = vsub.f32 %v399_v34, %v401_v29  ;;  %v406_v40 = vadd.f32 %v405_v33, %v404_v36  ;;  %p886_p1 = scmp.ne.s32.totalorder %s884_s8, %s885_s6  ;;  %p891_p11 = scmp.lt.s32.totalorder %s889_s3, %s885_s6 }
  0x49   : > { %v415_v42 = vadd.f32 %v414_v35, %v402_v38  ;;  %v420_v43 = vadd.f32 %v419_v37, %v406_v40  ;;  %p887_p3 = pnand %p886_p1, %p1105_p2  ;;  %p892_p12 = por %p891_p11, %p890_p10 }
  0x4b   : > { %v418_v44 = vsub.f32 %v415_v42, %v417_v39  ;;  %v422_v45 = vadd.f32 %v421_v41, %v420_v43  ;;  %p888_p9 = pneg %p887_p3 }
  0x4d   : > { %423 = vst [vmem:[%s353_s21] sm:$0xf] %v418_v44  ;;  %p893_p13 = pnand %p892_p12, %p888_p9 }
  0x4e   : > { %424 = vst [vmem:[%s360_s11] sm:$0xf] %v422_v45 }
  0x4f   : > { %896 = shalt.err (!%p893_p13)
}
  0x50   : > { %658 = dma.vmem_to_hbm [thread:$0]  (%p1105_p2), %s445_s10, 64, %s447_s17, %s426_s15  }
  0x51   : > { %s431_s24 = scalar_lea.sflag [#allocation12], %s1131_s16  ;;  %s911_s28 = sshra.s32 %s1183_s13, 4  ;;  %s912_s28 = int_to_ptr.hbm [resolvable:$true] %s911_s28 }
  0x52   : > { %s913_s25 = scalar_lea.hbm %s912_s28, 4  ;;  %s917_s7 = scalar_lea.hbm %s1239_s5, 8 }
  0x53   : > { %p914_p0 = scmp.ne.s32.totalorder %s912_s28, %s913_s25  ;;  %p918_p8 = scmp.lt.s32.totalorder %s912_s28, %s1239_s5 }
  0x54   : > { %p919_p1 = scmp.lt.s32.totalorder %s917_s7, %s913_s25 }
  0x55   : > { %p915_p4 = pnand %p914_p0, %p1105_p2 }
  0x56   : > { %p920_p3 = por %p919_p1, %p918_p8 }
  0x57   : > { %p916_p7 = pneg %p915_p4 }
  0x59   : > { %p921_p9 = pnand %p920_p3, %p916_p7 }
  0x5b   : > { %924 = shalt.err (!%p921_p9)
}
  0x5c   : > { %659 = dma.vmem_to_hbm [thread:$0]  (%p1105_p2), %s460_s12, 64, %s1183_s13, %s431_s24  }
  0x5d PF: > { %s473_s16 = sand.u32 1, %s975_s18   ;;  %p677_p10 = pnand %p628_p6, %p1112_p5 }
  0x5e   : > { %s474_s10 = scalar_lea.sflag [#allocation4], %s473_s16 }
  0x5f   : > { %p678_p11 = pneg %p677_p10 }
  0x61   : > { %966 = dma.done.wait (%p678_p11), %s474_s10, 64  }
  0x62   : > { %968 = vsyncadd (%p678_p11), %s474_s10, 4294967232  ;;  %s484_s11 = scalar_lea.sflag [#allocation12], %s473_s16 }
  0x63   : > { %970 = dma.done.wait (%p678_p11), %s484_s11, 64  }
  0x64   : > { %972 = vsyncadd (%p678_p11), %s484_s11, 4294967232  ;;  %s29_s23 = sadd.s32 1, %s995_s23   ;;  %s1256_s26 = sld [smem:[#allocation19_spill]] }
  0x65   : > { %p26_p12 = scmp.ge.s32.totalorder %s29_s23, 4   ;;  %s1257_s20 = sld [smem:[#allocation22_spill]] }
  0x66   : > { %s1258_s21 = sld [smem:[#allocation20_spill]]  ;;  %s1260_s18 = smov %s979_s19 }
  0x67   : > { %s1259_s22 = sld [smem:[#allocation21_spill]]  ;;  %28 = sbr.rel (!%p26_p12) target bundleno = 14 (0xe), region = 127 }
  0x6a   : > { %s1261_s19 = smov %s1256_s26 }
  0x6c   :  { %490 = vsyncpa [#allocation3], 1 }
  0x6d   :  { %492 = vsyncpa [#allocation3 + $0x1], 1 }
  0x6e   :  { %493 = vsyncpa [#allocation6], 1 }
  0x6f   :  { %495 = vsyncpa [#allocation6 + $0x1], 1 }
  0x70   :  { %496 = vsyncpa [#allocation9], 1 }
  0x71   :  { %497 = vsyncpa [#allocation4], 1 }
  0x72   :  { %499 = vsyncpa [#allocation4 + $0x1], 1 }
  0x73   :  { %500 = vsyncpa [#allocation12], 1 }
  0x74   :  { %502 = vsyncpa [#allocation12 + $0x1], 1 }

</bundles_post_ra>
